<compile_context>
chip_gen: v7x
topology: tpu7x:2x2x1
jax: 0.10.0
libtpu: 0.0.40
codegen_flags: <defaults>
</compile_context>

<pallas_src>
import functools

import jax
import jax.numpy as jnp
from jax.experimental import pallas as pl
from jax.experimental.pallas import tpu as pltpu

_LANE = 128
_SUBLANE = 8


def _round_up(x: int, m: int) -> int:
    return (x + m - 1) // m * m


def _ffn_kernel(x_ref, w1_ref, b1_ref, w2_ref, b2_ref, scale_ref, bias_ref,
                o_ref, *, adaptive_scale: bool, matmul_dtype):
    # Elementwise prologue in f32 (keeps v5e VALU happy; bf16 only at the MXU).
    x = x_ref[...].astype(jnp.float32)                              # (TM, Dp)
    if adaptive_scale:
        x = (scale_ref[...].astype(jnp.float32) * x
             + bias_ref[...].astype(jnp.float32))                   # bcast (1, Dp)

    h = jnp.dot(x.astype(matmul_dtype), w1_ref[...],
                preferred_element_type=jnp.float32)                 # (TM, Hp) f32
    h = jnp.maximum(h + b1_ref[...].astype(jnp.float32), 0.0)       # bias + ReLU

    # TODO(synk): dropout is identity (eval mode); training-mode dropout would
    # use pltpu.prng_seed + pltpu.prng_random_bits inside the kernel.
    y = jnp.dot(h.astype(matmul_dtype), w2_ref[...],
                preferred_element_type=jnp.float32)                 # (TM, Dp) f32
    y = y + b2_ref[...].astype(jnp.float32)
    o_ref[...] = y.astype(o_ref.dtype)


def positionwise_feed_forward(xs, w1, b1, w2, b2, ada_scale=None, ada_bias=None,
                              *, adaptive_scale: bool = False, tm: int = 256,
                              use_bf16: bool = True,
                              vmem_budget_bytes: int = 64 * 1024 * 1024):
    """xs: (B, L, D) -> (B, L, D).  Weights stored as W1:(D,H), W2:(H,D)."""
    B, L, D = xs.shape
    H = w1.shape[1]
    M = B * L

    Dp = _round_up(D, _LANE)
    Hp = _round_up(H, _LANE)
    matmul_dtype = jnp.bfloat16 if use_bf16 else xs.dtype

    isz_x = jnp.dtype(xs.dtype).itemsize
    isz_mm = jnp.dtype(matmul_dtype).itemsize

    def _vmem_estimate(t: int) -> int:
        tiles = 2 * t * Dp * isz_x            # x tile, double-buffered
        tiles += 2 * t * Dp * isz_x           # out tile, double-buffered
        weights = 2 * (Dp * Hp + Hp * Dp) * isz_mm   # W1, W2 (double-buffered)
        vecs = 2 * (Hp + 3 * Dp) * 4          # b1, b2, scale, bias
        live = t * Hp * 4 + 2 * t * Dp * 4    # f32 h intermediate + f32 x/y temps
        return tiles + weights + vecs + live

    # Row tile: as large as requested but VMEM-budget-aware (v7x has 64 MiB).
    # TODO(synk): for very large H on v7x, split H onto an "arbitrary" grid
    # axis with an f32 accumulator instead of shrinking tm further.
    budget = int(0.75 * vmem_budget_bytes)
    tm_eff = _round_up(max(_SUBLANE, min(tm, M)), _SUBLANE)
    while tm_eff > _SUBLANE and _vmem_estimate(tm_eff) > budget:
        tm_eff = _round_up(max(_SUBLANE, tm_eff // 2), _SUBLANE)
    Mp = _round_up(M, tm_eff)

    # Zero-pad everything to lane/sublane-aligned shapes (padding contributes
    # nothing: padded W1 rows / W2 rows are zero, ReLU(0 + 0) = 0).
    x2d = jnp.pad(xs.reshape(M, D), ((0, Mp - M), (0, Dp - D)))
    w1p = jnp.pad(w1, ((0, Dp - D), (0, Hp - H))).astype(matmul_dtype)
    w2p = jnp.pad(w2, ((0, Hp - H), (0, Dp - D))).astype(matmul_dtype)
    b1p = jnp.pad(b1.reshape(1, H), ((0, 0), (0, Hp - H))).astype(jnp.float32)
    b2p = jnp.pad(b2.reshape(1, D), ((0, 0), (0, Dp - D))).astype(jnp.float32)
    if ada_scale is None:
        ada_scale = jnp.ones((D,), xs.dtype)
    if ada_bias is None:
        ada_bias = jnp.zeros((D,), xs.dtype)
    scale2d = jnp.pad(ada_scale.reshape(1, D),
                      ((0, 0), (0, Dp - D))).astype(jnp.float32)
    bias2d = jnp.pad(ada_bias.reshape(1, D),
                     ((0, 0), (0, Dp - D))).astype(jnp.float32)

    grid = (Mp // tm_eff,)
    cost = pl.CostEstimate(
        flops=2 * M * (D * H + H * D),
        transcendentals=0,
        bytes_accessed=(2 * M * D * isz_x
                        + (D * H + H * D) * isz_mm
                        + (H + 3 * D) * 4))

    vmem_limit = int(min(vmem_budget_bytes,
                         max(32 * 1024 * 1024,
                             _vmem_estimate(tm_eff) + (4 << 20))))

    out2d = pl.pallas_call(
        functools.partial(_ffn_kernel, adaptive_scale=adaptive_scale,
                          matmul_dtype=matmul_dtype),
        out_shape=jax.ShapeDtypeStruct((Mp, Dp), xs.dtype),
        grid_spec=pltpu.PrefetchScalarGridSpec(
            num_scalar_prefetch=0,
            grid=grid,
            in_specs=[
                pl.BlockSpec((tm_eff, Dp), lambda i: (i, 0)),  # x rows
                pl.BlockSpec((Dp, Hp), lambda i: (0, 0)),      # W1 (resident)
                pl.BlockSpec((1, Hp), lambda i: (0, 0)),       # b1
                pl.BlockSpec((Hp, Dp), lambda i: (0, 0)),      # W2 (resident)
                pl.BlockSpec((1, Dp), lambda i: (0, 0)),       # b2
                pl.BlockSpec((1, Dp), lambda i: (0, 0)),       # ada_scale
                pl.BlockSpec((1, Dp), lambda i: (0, 0)),       # ada_bias
            ],
            out_specs=pl.BlockSpec((tm_eff, Dp), lambda i: (i, 0)),
        ),
        compiler_params=pltpu.CompilerParams(
            dimension_semantics=("parallel",),
            vmem_limit_bytes=vmem_limit),
        cost_estimate=cost,
    )(x2d, w1p, b1p, w2p, b2p, scale2d, bias2d)

    return out2d[:M, :D].reshape(B, L, D)


def _reference(xs, w1, b1, w2, b2, ada_scale, ada_bias, adaptive_scale):
    x = xs
    if adaptive_scale:
        x = ada_scale * x + ada_bias
    h = jnp.maximum(jnp.einsum("bld,dh->blh", x, w1) + b1, 0.0)
    return jnp.einsum("blh,hd->bld", h, w2) + b2


if __name__ == "__main__":
    # Small shapes consistent with the module: (B, L, D) with hidden H.
    B, L, D, H = 2, 8, 32, 64
    key = jax.random.PRNGKey(0)
    k_x, k_w1, k_b1, k_w2, k_b2, k_s, k_b = jax.random.split(key, 7)

    xs = jax.random.normal(k_x, (B, L, D), dtype=jnp.float32)

    # Deterministic "init_weights"-style uniform init (shapes per nn.Linear,
    # stored transposed for row-major matmul in the kernel).
    ffn1_max = D ** -0.5
    ffn2_max = H ** -0.5
    w1 = jax.random.uniform(k_w1, (D, H), minval=-ffn1_max, maxval=ffn1_max,
                            dtype=jnp.float32)
    b1 = jax.random.uniform(k_b1, (H,), minval=-ffn1_max, maxval=ffn1_max,
                            dtype=jnp.float32)
    w2 = jax.random.uniform(k_w2, (H, D), minval=-ffn2_max, maxval=ffn2_max,
                            dtype=jnp.float32)
    b2 = jax.random.uniform(k_b2, (D,), minval=-ffn2_max, maxval=ffn2_max,
                            dtype=jnp.float32)

    # ada params as in __init__: ones / zeros, shape (1, 1, D)
    ada_scale = jnp.ones((1, 1, D), dtype=jnp.float32)
    ada_bias = jnp.zeros((1, 1, D), dtype=jnp.float32)

    # 1) Exact f32 path vs reference (module default: adaptive_scale=False).
    ref = _reference(xs, w1, b1, w2, b2, ada_scale, ada_bias, False)
    out = positionwise_feed_forward(xs, w1, b1, w2, b2, ada_scale, ada_bias,
                                    adaptive_scale=False, use_bf16=False)
    out = jax.block_until_ready(out)
    assert out.shape == (B, L, D)
    assert jnp.allclose(out, ref, atol=1e-5, rtol=1e-5)

    # 2) Adaptive-scale branch with non-trivial scale/bias (f32 path).
    a_s = 1.0 + 0.1 * jax.random.normal(k_s, (1, 1, D), dtype=jnp.float32)
    a_b = 0.1 * jax.random.normal(k_b, (1, 1, D), dtype=jnp.float32)
    ref_ada = _reference(xs, w1, b1, w2, b2, a_s, a_b, True)
    out_ada = positionwise_feed_forward(xs, w1, b1, w2, b2, a_s, a_b,
                                        adaptive_scale=True, use_bf16=False)
    out_ada = jax.block_until_ready(out_ada)
    assert jnp.allclose(out_ada, ref_ada, atol=1e-5, rtol=1e-5)

    # 3) bf16-MXU path (production config), looser tolerance vs f32 reference.
    out_bf16 = positionwise_feed_forward(xs, w1, b1, w2, b2, ada_scale, ada_bias,
                                         adaptive_scale=False, use_bf16=True)
    out_bf16 = jax.block_until_ready(out_bf16)
    assert jnp.allclose(out_bf16, ref, atol=3e-2, rtol=3e-2)

    print("KERNEL_OK")
</pallas_src>

<mosaic_0001>
module attributes {stable_mosaic.version = 11 : i64} {
  func.func @_ffn_kernel(%arg0: i32, %arg1: memref<16x128xf32, #tpu.memory_space<vmem>>, %arg2: memref<128x128xf32, #tpu.memory_space<vmem>>, %arg3: memref<1x128xf32, #tpu.memory_space<vmem>>, %arg4: memref<128x128xf32, #tpu.memory_space<vmem>>, %arg5: memref<1x128xf32, #tpu.memory_space<vmem>>, %arg6: memref<1x128xf32, #tpu.memory_space<vmem>>, %arg7: memref<1x128xf32, #tpu.memory_space<vmem>>, %arg8: memref<16x128xf32, #tpu.memory_space<vmem>>) attributes {dimension_semantics = [#tpu.dimension_semantics<parallel>], iteration_bounds = array<i64: 1>, scalar_prefetch = 0 : i64, scratch_operands = 0 : i64, tpu.core_type = #tpu.core_type<tc>, window_params = [{transform_indices = @transform_0, window_bounds = array<i64: 16, 128>}, {pipeline_mode = #tpu.pipeline_mode<synchronous>, transform_indices = @transform_1, window_bounds = array<i64: 128, 128>}, {pipeline_mode = #tpu.pipeline_mode<synchronous>, transform_indices = @transform_2, window_bounds = array<i64: 1, 128>}, {pipeline_mode = #tpu.pipeline_mode<synchronous>, transform_indices = @transform_3, window_bounds = array<i64: 128, 128>}, {pipeline_mode = #tpu.pipeline_mode<synchronous>, transform_indices = @transform_4, window_bounds = array<i64: 1, 128>}, {pipeline_mode = #tpu.pipeline_mode<synchronous>, transform_indices = @transform_5, window_bounds = array<i64: 1, 128>}, {pipeline_mode = #tpu.pipeline_mode<synchronous>, transform_indices = @transform_6, window_bounds = array<i64: 1, 128>}, {transform_indices = @transform_7, window_bounds = array<i64: 16, 128>}]} {
    %c0 = arith.constant 0 : index
    %c0_0 = arith.constant 0 : index
    %0 = vector.load %arg1[%c0, %c0_0] : memref<16x128xf32, #tpu.memory_space<vmem>>, vector<16x128xf32>
    %c0_1 = arith.constant 0 : index
    %c0_2 = arith.constant 0 : index
    %1 = vector.load %arg2[%c0_1, %c0_2] : memref<128x128xf32, #tpu.memory_space<vmem>>, vector<128x128xf32>
    %cst = arith.constant dense<0.000000e+00> : vector<16x128xf32>
    %2 = tpu.matmul %0, %1, %cst {dimension_numbers = #tpu.dot_dimension_numbers<[1], [0], [0], [1], [0, 0, 1, 1], [], []>} : vector<16x128xf32>, vector<128x128xf32>, vector<16x128xf32> -> vector<16x128xf32>
    %c0_3 = arith.constant 0 : index
    %c0_4 = arith.constant 0 : index
    %3 = vector.load %arg3[%c0_3, %c0_4] : memref<1x128xf32, #tpu.memory_space<vmem>>, vector<1x128xf32>
    %4 = vector.broadcast %3 : vector<1x128xf32> to vector<16x128xf32>
    %5 = arith.addf %2, %4 : vector<16x128xf32>
    %cst_5 = arith.constant 0.000000e+00 : f32
    %6 = vector.broadcast %cst_5 : f32 to vector<16x128xf32>
    %7 = arith.maximumf %5, %6 : vector<16x128xf32>
    %c0_6 = arith.constant 0 : index
    %c0_7 = arith.constant 0 : index
    %8 = vector.load %arg4[%c0_6, %c0_7] : memref<128x128xf32, #tpu.memory_space<vmem>>, vector<128x128xf32>
    %cst_8 = arith.constant dense<0.000000e+00> : vector<16x128xf32>
    %9 = tpu.matmul %7, %8, %cst_8 {dimension_numbers = #tpu.dot_dimension_numbers<[1], [0], [0], [1], [0, 0, 1, 1], [], []>} : vector<16x128xf32>, vector<128x128xf32>, vector<16x128xf32> -> vector<16x128xf32>
    %c0_9 = arith.constant 0 : index
    %c0_10 = arith.constant 0 : index
    %10 = vector.load %arg5[%c0_9, %c0_10] : memref<1x128xf32, #tpu.memory_space<vmem>>, vector<1x128xf32>
    %11 = vector.broadcast %10 : vector<1x128xf32> to vector<16x128xf32>
    %12 = arith.addf %9, %11 : vector<16x128xf32>
    %c0_11 = arith.constant 0 : index
    %c0_12 = arith.constant 0 : index
    %13 = vector.load %arg8[%c0_11, %c0_12] : memref<16x128xf32, #tpu.memory_space<vmem>>, vector<16x128xf32>
    tpu.vector_store %arg8[%c0_11, %c0_12], %12 {strides = array<i32>} : memref<16x128xf32, #tpu.memory_space<vmem>>, vector<16x128xf32>,
    return
  }
  func.func @transform_0(%arg0: i32) -> (i32, i32) {
    %c0_i32 = arith.constant 0 : i32
    %c0_i32_0 = arith.constant 0 : i32
    return %arg0, %c0_i32 : i32, i32
  }
  func.func @transform_1(%arg0: i32) -> (i32, i32) {
    %c0_i32 = arith.constant 0 : i32
    %c0_i32_0 = arith.constant 0 : i32
    %c0_i32_1 = arith.constant 0 : i32
    return %c0_i32, %c0_i32_0 : i32, i32
  }
  func.func @transform_2(%arg0: i32) -> (i32, i32) {
    %c0_i32 = arith.constant 0 : i32
    %c0_i32_0 = arith.constant 0 : i32
    %c0_i32_1 = arith.constant 0 : i32
    return %c0_i32, %c0_i32_0 : i32, i32
  }
  func.func @transform_3(%arg0: i32) -> (i32, i32) {
    %c0_i32 = arith.constant 0 : i32
    %c0_i32_0 = arith.constant 0 : i32
    %c0_i32_1 = arith.constant 0 : i32
    return %c0_i32, %c0_i32_0 : i32, i32
  }
  func.func @transform_4(%arg0: i32) -> (i32, i32) {
    %c0_i32 = arith.constant 0 : i32
    %c0_i32_0 = arith.constant 0 : i32
    %c0_i32_1 = arith.constant 0 : i32
    return %c0_i32, %c0_i32_0 : i32, i32
  }
  func.func @transform_5(%arg0: i32) -> (i32, i32) {
    %c0_i32 = arith.constant 0 : i32
    %c0_i32_0 = arith.constant 0 : i32
    %c0_i32_1 = arith.constant 0 : i32
    return %c0_i32, %c0_i32_0 : i32, i32
  }
  func.func @transform_6(%arg0: i32) -> (i32, i32) {
    %c0_i32 = arith.constant 0 : i32
    %c0_i32_0 = arith.constant 0 : i32
    %c0_i32_1 = arith.constant 0 : i32
    return %c0_i32, %c0_i32_0 : i32, i32
  }
  func.func @transform_7(%arg0: i32) -> (i32, i32) {
    %c0_i32 = arith.constant 0 : i32
    %c0_i32_0 = arith.constant 0 : i32
    return %arg0, %c0_i32 : i32, i32
  }
}

</mosaic_0001>

<bundles_post_ra>
// kernel: tpu_custom_call.1
= control target key start
LH: loop header
LB: loop body
LE: loop exit
PB: predicated region body
PF: predicated region fallthrough
CT: control target
= control target key end

     0   :  { %12 = vsyncpa [#allocation3], 0  ;;  %s679_s0 = inlined_call_operand.hbm [shape: f32[16,128], index: 0, kind: input, shape index: {}]   ;;  %s680_s1 = inlined_call_operand.hbm [shape: f32[128,128], index: 1, kind: input, shape index: {}]   ;;  %s681_s2 = inlined_call_operand.vmem [shape: f32[1,128], index: 2, kind: input, shape index: {}]   ;;  %s682_s3 = inlined_call_operand.hbm [shape: f32[128,128], index: 3, kind: input, shape index: {}]   ;;  %s683_s4 = inlined_call_operand.vmem [shape: f32[1,128], index: 4, kind: input, shape index: {}]   ;;  %s684_s5 = inlined_call_operand.vmem [shape: f32[1,128], index: 5, kind: input, shape index: {}]   ;;  %s685_s6 = inlined_call_operand.vmem [shape: f32[1,128], index: 6, kind: input, shape index: {}]   ;;  %s686_s7 = inlined_call_operand.hbm [shape: f32[16,128], index: 7, kind: output, shape index: {}]  }
   0x1   :  { %13 = vsyncpa [#allocation6], 0 }
   0x2   :  { %14 = vsyncpa [#allocation4], 0  ;;  %s560_s24 = smov [#allocation5]   ;;  %s561_s26 = smov [#allocation2]  }
   0x3   :  { %s32_s25 = sshll.u32 %s560_s24, 4  ;;  %s20_s27 = sshll.u32 %s561_s26, 4  ;;  %s33_s25 = int_to_ptr.vmem [resolvable:$true] %s32_s25  ;;  %s606_s27 = int_to_ptr.vmem [resolvable:$true] %s20_s27 }
   0x4   :  { %s466_s5 = scalar_lea.hbm %s680_s1, 2048 }
   0x5   :  { %p467_p0 = scmp.ne.s32.totalorder %s680_s1, %s466_s5  ;;  %p470_p1 = scmp.lt.u32.totalorder %s466_s5, %s680_s1 }
   0x7   :  { %p472_p2 = pnand %p470_p1, %p467_p0 }
   0x9   :  { %475 = shalt.err (!%p472_p2)
}
   0xa   :  { %s476_s10 = scalar_lea.vmem %s33_s25, 2048  ;;  %p481_p4 = scmp.lt.s32.totalorder %s33_s25, %s33_s25 }
   0xb   :  { %p477_p3 = scmp.ne.s32.totalorder %s33_s25, %s476_s10  ;;  %p482_p5 = scmp.lt.s32.totalorder %s476_s10, %s476_s10 }
   0xd   :  { %p483_p6 = por %p482_p5, %p481_p4 }
   0xf   :  { %p484_p7 = pnand %p483_p6, %p477_p3 }
  0x11   :  { %487 = shalt.err (!%p484_p7)
}
  0x12   :  { %s562_s11 = smov 128   ;;  %s563_s12 = smov 8  }
  0x13   :  { %38 = dma.hbm_to_vmem [thread:$0]  %s680_s1, 2048, %s33_s25, [#allocation6], %s562_s11, %s562_s11, %s563_s12  }
  0x14   :  { %s488_s17 = scalar_lea.hbm %s679_s0, 256 }
  0x15   :  { %p489_p8 = scmp.ne.s32.totalorder %s679_s0, %s488_s17  ;;  %p492_p9 = scmp.lt.u32.totalorder %s488_s17, %s679_s0 }
  0x17   :  { %p494_p10 = pnand %p492_p9, %p489_p8 }
  0x19   :  { %497 = shalt.err (!%p494_p10)
}
  0x1a   :  { %s498_s22 = scalar_lea.vmem %s606_s27, 256  ;;  %p503_p12 = scmp.lt.s32.totalorder %s606_s27, %s606_s27 }
  0x1b   :  { %p499_p11 = scmp.ne.s32.totalorder %s606_s27, %s498_s22  ;;  %p504_p13 = scmp.lt.s32.totalorder %s498_s22, %s498_s22 }
  0x1d   :  { %p505_p0 = por %p504_p13, %p503_p12 }
  0x1f   :  { %p506_p1 = pnand %p505_p0, %p499_p11 }
  0x21   :  { %509 = shalt.err (!%p506_p1)
}
  0x22   :  { %26 = dma.hbm_to_vmem [thread:$0]  %s679_s0, 256, %s606_s27, [#allocation3], %s562_s11, %s562_s11, %s563_s12  }
  0x23   :  { %s564_s24 = smov [#allocation7]   ;;  %s510_s29 = scalar_lea.hbm %s682_s3, 2048 }
  0x24   :  { %s46_s25 = sshll.u32 %s564_s24, 4  ;;  %p511_p2 = scmp.ne.s32.totalorder %s682_s3, %s510_s29  ;;  %s47_s25 = int_to_ptr.vmem [resolvable:$true] %s46_s25 }
  0x25   :  { %p514_p3 = scmp.lt.u32.totalorder %s510_s29, %s682_s3 }
  0x27   :  { %p516_p4 = pnand %p514_p3, %p511_p2 }
  0x29   :  { %519 = shalt.err (!%p516_p4)
}
  0x2a   :  { %s520_s9 = scalar_lea.vmem %s47_s25, 2048  ;;  %p525_p6 = scmp.lt.s32.totalorder %s47_s25, %s47_s25 }
  0x2b   :  { %p521_p5 = scmp.ne.s32.totalorder %s47_s25, %s520_s9  ;;  %p526_p7 = scmp.lt.s32.totalorder %s520_s9, %s520_s9 }
  0x2d   :  { %p527_p8 = por %p526_p7, %p525_p6 }
  0x2f   :  { %p528_p9 = pnand %p527_p8, %p521_p5 }
  0x31   :  { %531 = shalt.err (!%p528_p9)
}
  0x32   :  { %52 = dma.hbm_to_vmem [thread:$0]  %s682_s3, 2048, %s47_s25, [#allocation6], %s562_s11, %s562_s11, %s563_s12  }
  0x33   :  { %554 = dma.done.wait [#allocation3], 256  }
  0x34   :  { %555 = vsyncadd [#allocation3], 4294967040 }
  0x35   :  { %556 = dma.done.wait [#allocation6], 4096  }
  0x36   :  { %557 = vsyncadd [#allocation6], 4294963200  ;;  %v70_v0 = vld [vmem:[#allocation5] sm:$0xff]  ;;  %v71_v1 = vld [vmem:[#allocation5 + $0x8] sm:$0xff]  ;;  %s565_s15 = smov [#allocation8]  }
  0x37   :  { %v72_v2 = vld [vmem:[#allocation5 + $0x10] sm:$0xff]  ;;  %v396_v3 = vpack.c.bf16 %v71_v1, %v70_v0  ;;  %v73_v4 = vld [vmem:[#allocation5 + $0x18] sm:$0xff]  ;;  %v74_v6 = vld [vmem:[#allocation5 + $0x20] sm:$0xff]  ;;  %s275_s16 = sshll.u32 %s565_s15, 4  ;;  %s276_s16 = int_to_ptr.vmem [resolvable:$true] %s275_s16 }
  0x38   :  { %v400_v5 = vpack.c.bf16 %v73_v4, %v72_v2  ;;  %v75_v7 = vld [vmem:[#allocation5 + $0x28] sm:$0xff]  ;;  %v76_v9 = vld [vmem:[#allocation5 + $0x30] sm:$0xff]  ;;  %v77_v10 = vld [vmem:[#allocation5 + $0x38] sm:$0xff]  ;;  %p537_p11 = scmp.lt.s32.totalorder %s276_s16, %s276_s16 }
  0x39   :  { %397 = vmatprep.subr.bf16.mxu0 %v396_v3  ;;  %v404_v8 = vpack.c.bf16 %v75_v7, %v74_v6  ;;  %v68_v11 = vld [vmem:[#allocation2] sm:$0xff]  ;;  %v170_v12 = vld [vmem:[#allocation7] sm:$0xff]  ;;  %v171_v13 = vld [vmem:[#allocation7 + $0x8] sm:$0xff]  ;;  %v408_v20 = vpack.c.bf16 %v77_v10, %v76_v9 }
  0x3a   :  { %399 = vmatpush3.bf16.msra.mxu0 %v396_v3  ;;  %358 = vmatprep.mubr.f32.mxu0 %v68_v11  ;;  %v172_v14 = vld [vmem:[#allocation7 + $0x10] sm:$0xff]  ;;  %v428_v15 = vpack.c.bf16 %v171_v13, %v170_v12  ;;  %v173_v16 = vld [vmem:[#allocation7 + $0x18] sm:$0xff]  ;;  %v174_v18 = vld [vmem:[#allocation7 + $0x20] sm:$0xff] }
  0x3b   :  { %401 = vmatprep.subr.bf16.mxu0 %v400_v5  ;;  %v432_v17 = vpack.c.bf16 %v173_v16, %v172_v14  ;;  %v175_v19 = vld [vmem:[#allocation7 + $0x28] sm:$0xff]  ;;  %v78_v21 = vld [vmem:[#allocation5 + $0x40] sm:$0xff]  ;;  %v176_v24 = vld [vmem:[#allocation7 + $0x30] sm:$0xff] }
  0x3c   :  { %429 = vmatprep.subr.bf16.mxu1 %v428_v15  ;;  %v79_v22 = vld [vmem:[#allocation5 + $0x48] sm:$0xff]  ;;  %v436_v23 = vpack.c.bf16 %v175_v19, %v174_v18  ;;  %v177_v25 = vld [vmem:[#allocation7 + $0x38] sm:$0xff]  ;;  %v80_v27 = vld [vmem:[#allocation5 + $0x50] sm:$0xff] }
  0x3d   :  { %431 = vmatpush3.bf16.msra.mxu1 %v428_v15  ;;  %v412_v26 = vpack.c.bf16 %v79_v22, %v78_v21  ;;  %v81_v28 = vld [vmem:[#allocation5 + $0x58] sm:$0xff]  ;;  %v440_v29 = vpack.c.bf16 %v177_v25, %v176_v24  ;;  %v178_v30 = vld [vmem:[#allocation7 + $0x40] sm:$0xff]  ;;  %v179_v31 = vld [vmem:[#allocation7 + $0x48] sm:$0xff] }
  0x3e   :  { %403 = vmatpush3.bf16.msra.mxu0 %v400_v5  ;;  %433 = vmatprep.subr.bf16.mxu1 %v432_v17  ;;  %v416_v32 = vpack.c.bf16 %v81_v28, %v80_v27  ;;  %v82_v33 = vld [vmem:[#allocation5 + $0x60] sm:$0xff]  ;;  %v83_v34 = vld [vmem:[#allocation5 + $0x68] sm:$0xff]  ;;  %v444_v35 = vpack.c.bf16 %v179_v31, %v178_v30  ;;  %v180_v36 = vld [vmem:[#allocation7 + $0x50] sm:$0xff] }
  0x3f   :  { %405 = vmatprep.subr.bf16.mxu0 %v404_v8  ;;  %v181_v37 = vld [vmem:[#allocation7 + $0x58] sm:$0xff]  ;;  %v420_v38 = vpack.c.bf16 %v83_v34, %v82_v33  ;;  %v84_v39 = vld [vmem:[#allocation5 + $0x70] sm:$0xff]  ;;  %v182_v42 = vld [vmem:[#allocation7 + $0x60] sm:$0xff] }
  0x40   :  { %v85_v40 = vld [vmem:[#allocation5 + $0x78] sm:$0xff]  ;;  %v448_v41 = vpack.c.bf16 %v181_v37, %v180_v36  ;;  %v183_v43 = vld [vmem:[#allocation7 + $0x68] sm:$0xff]  ;;  %v184_v47 = vld [vmem:[#allocation7 + $0x70] sm:$0xff] }
  0x41   :  { %435 = vmatpush3.bf16.msra.mxu1 %v432_v17  ;;  %v424_v44 = vpack.c.bf16 %v85_v40, %v84_v39  ;;  %v452_v45 = vpack.c.bf16 %v183_v43, %v182_v42  ;;  %v69_v46 = vld [vmem:[#allocation2 + $0x8] sm:$0xff]  ;;  %v288_v50 = vld [vmem:[%s681_s2] ss:$0 sm:$0xff]  ;;  %s532_s2 = scalar_lea.vmem %s276_s16, 256 }
  0x42   :  { %407 = vmatpush3.bf16.msra.mxu0 %v404_v8  ;;  %437 = vmatprep.subr.bf16.mxu1 %v436_v23  ;;  %v185_v48 = vld [vmem:[#allocation7 + $0x78] sm:$0xff]  ;;  %v289_v57 = vld [vmem:[%s683_s4] ss:$0 sm:$0xff]  ;;  %p533_p10 = scmp.ne.s32.totalorder %s276_s16, %s532_s2  ;;  %p538_p12 = scmp.lt.s32.totalorder %s532_s2, %s532_s2 }
  0x43   :  { %409 = vmatprep.subr.bf16.mxu0 %v408_v20  ;;  %v456_v49 = vpack.c.bf16 %v185_v48, %v184_v47 }
  0x44   :  { %p539_p13 = por %p538_p12, %p537_p11 }
  0x45   :  { %439 = vmatpush3.bf16.msra.mxu1 %v436_v23 }
  0x46   :  { %411 = vmatpush3.bf16.msra.mxu0 %v408_v20  ;;  %441 = vmatprep.subr.bf16.mxu1 %v440_v29  ;;  %p540_p0 = pnand %p539_p13, %p533_p10 }
  0x47   :  { %413 = vmatprep.subr.bf16.mxu0 %v412_v26 }
  0x49   :  { %443 = vmatpush3.bf16.msra.mxu1 %v440_v29 }
  0x4a   :  { %415 = vmatpush3.bf16.msra.mxu0 %v412_v26  ;;  %445 = vmatprep.subr.bf16.mxu1 %v444_v35 }
  0x4b   :  { %417 = vmatprep.subr.bf16.mxu0 %v416_v32 }
  0x4d   :  { %447 = vmatpush3.bf16.msra.mxu1 %v444_v35 }
  0x4e   :  { %419 = vmatpush3.bf16.msra.mxu0 %v416_v32  ;;  %449 = vmatprep.subr.bf16.mxu1 %v448_v41 }
  0x4f   :  { %421 = vmatprep.subr.bf16.mxu0 %v420_v38 }
  0x51   :  { %451 = vmatpush3.bf16.msra.mxu1 %v448_v41 }
  0x52   :  { %423 = vmatpush3.bf16.msra.mxu0 %v420_v38  ;;  %453 = vmatprep.subr.bf16.mxu1 %v452_v45 }
  0x53   :  { %425 = vmatprep.subr.bf16.mxu0 %v424_v44 }
  0x55   :  { %455 = vmatpush3.bf16.msra.mxu1 %v452_v45 }
  0x56   :  { %427 = vmatpush3.bf16.msra.mxu0 %v424_v44  ;;  %457 = vmatprep.subr.bf16.mxu1 %v456_v49 }
  0x59   :  { %359 = vmatmul.mubr.f32.vlgmr.msra.gmra.mrb[0].mxu0 %v69_v46  ;;  %459 = vmatpush3.bf16.msra.mxu1 %v456_v49 }
 0x12c   :  { %v360_v51 = vpop.f32.mrb[0].mxu0 }
 0x12d   :  { %v165_v52 = vadd.f32 %v360_v51, %v288_v50  ;;  %v159_v53 = vpop.f32.mrb[1].mxu0 }
 0x12e   :  { %v160_v54 = vadd.f32 %v288_v50, %v159_v53 }
 0x12f   :  { %v169_v56 = vmax.f32 %v165_v52, 0.0 }
 0x130   :  { %v168_v55 = vmax.f32 %v160_v54, 0.0 }
 0x132   :  { %393 = vmatprep.mubr.f32.mxu1 %v168_v55 }
 0x133   :  { %394 = vmatmul.mubr.f32.vlgmr.msra.gmra.mrb[0].mxu1 %v169_v56 }
 0x206   :  { %v395_v58 = vpop.f32.mrb[0].mxu1 }
 0x207   :  { %v265_v59 = vadd.f32 %v395_v58, %v289_v57  ;;  %v259_v60 = vpop.f32.mrb[1].mxu1 }
 0x208   :  { %v260_v61 = vadd.f32 %v289_v57, %v259_v60 }
 0x209   :  { %269 = vst [vmem:[#allocation8 + $0x8] sm:$0xff] %v265_v59 }
 0x20a   :  { %268 = vst [vmem:[#allocation8] sm:$0xff] %v260_v61 }
 0x20b   :  { %543 = shalt.err (!%p540_p0)
}
 0x20c   :  { %s544_s4 = scalar_lea.hbm %s686_s7, 256 }
 0x20d   :  { %p545_p1 = scmp.ne.s32.totalorder %s686_s7, %s544_s4  ;;  %p548_p2 = scmp.lt.u32.totalorder %s544_s4, %s686_s7 }
 0x20f   :  { %p550_p3 = pnand %p548_p2, %p545_p1 }
 0x211   :  { %553 = shalt.err (!%p550_p3)
}
 0x212   :  { %281 = dma.vmem_to_hbm [thread:$0]  %s276_s16, 256, %s686_s7, [#allocation4], %s562_s11, %s562_s11, %s563_s12  }
 0x213   :  { %558 = dma.done.wait [#allocation4], 256  }
 0x214   :  { %559 = vsyncadd [#allocation4], 4294967040 }
 0x215   :  { %285 = vsyncpa [#allocation3], 1 }
 0x216   :  { %286 = vsyncpa [#allocation6], 1 }
 0x217   :  { %287 = vsyncpa [#allocation4], 1 }

</bundles_post_ra>
